<compile_context>
chip_gen: v7x
topology: tpu7x:2x2x1
jax: 0.10.0
libtpu: 0.0.40
codegen_flags: <defaults>
</compile_context>

<pallas_src>
import functools

import jax
import jax.numpy as jnp
from jax import lax
from jax.experimental import pallas as pl
from jax.experimental.pallas import tpu as pltpu


# MXU input dtype for the fused conv dot (accumulation is always f32).
MXU_DTYPE = jnp.bfloat16


# ----------------------------------------------------------------------------
# Pallas kernel: one image per grid step, two MXU dots.
# ----------------------------------------------------------------------------
def _fused_deconv_kernel(x2_ref, awcat_ref, wfold_ref, b_ref, o_ref, s_ref,
                         *, k, wpa, ch, c_out, ho, wo):
    """Fused bilinear-x2-upsample + zero-pad + kxk conv.

    x2_ref:    (Cin*H, W)           original image, (c,h) rows, f32.
    awcat_ref: (W, k*Wpa)           width upsample/pad operator, k dx-shifted
                                    copies concatenated along lanes, f32.
    wfold_ref: (Cout*Ho, k*Cin*H)   conv taps folded with the height-upsample
                                    operator (MXU dtype).
    b_ref:     (Cout, 1)            bias, f32.
    o_ref:     (Cout, Ho, Wo)       compact NCHW output block.
    s_ref:     (k*Cin*H, Wpa)       VMEM scratch: stage-1 result restacked on
                                    the contraction axis (MXU dtype).
    """
    # Stage 1: width upsample + zero-pad (+ k dx pre-shifts) as one dot.
    # Kept in f32: it touches the raw input and a tiny (W, k*Wpa) operator.
    xw = jnp.dot(x2_ref[...], awcat_ref[...],
                 preferred_element_type=jnp.float32)          # (Cin*H, k*Wpa)

    # Restack the k dx-shifted lane-blocks along the contraction (sublane)
    # axis.  ch is a multiple of 8 and Wpa a multiple of 128, so these are
    # full, unmasked tile stores.
    for dx in range(k):
        s_ref[pl.ds(dx * ch, ch), :] = (
            xw[:, dx * wpa:(dx + 1) * wpa].astype(s_ref.dtype))

    # Stage 2: height upsample + all k*k conv taps + Cin reduction as a single
    # (Cout*Ho, K) @ (K, Wpa) dot with K = k*Cin*H; f32 accumulation.
    acc = jnp.dot(wfold_ref[...], s_ref[...],
                  preferred_element_type=jnp.float32)         # (Cout*Ho, Wpa)

    # (Cout*Ho, Wpa) -> (Cout, Ho, Wpa) only splits the sublane axis (row-major
    # order unchanged); drop the padding columns and add bias.
    out = acc.reshape(c_out, ho, wpa)[:, :, :wo] + b_ref[...][:, :, None]
    o_ref[...] = out.astype(o_ref.dtype)


# ----------------------------------------------------------------------------
# Host-side operator construction (tiny, batch-independent).
# ----------------------------------------------------------------------------
def _bilinear_matrix(size_in, size_out):
    """Interpolation operator A (size_out, size_in): up = A @ signal.

    Matches F.interpolate(mode='bilinear', align_corners=True) along one axis.
    Built in f32 (no low-precision interpolation weights).
    """
    if size_in == 1:
        return jnp.ones((size_out, 1), jnp.float32)
    scale = (size_in - 1) / (size_out - 1)
    pos = jnp.arange(size_out, dtype=jnp.float32) * scale
    i0 = jnp.clip(jnp.floor(pos).astype(jnp.int32), 0, size_in - 1)
    i1 = jnp.minimum(i0 + 1, size_in - 1)
    frac = pos - i0.astype(jnp.float32)
    cols = jnp.arange(size_in, dtype=jnp.int32)[None, :]
    a = ((cols == i0[:, None]) * (1.0 - frac)[:, None]
         + (cols == i1[:, None]) * frac[:, None])
    return a.astype(jnp.float32)


# ----------------------------------------------------------------------------
# deconv forward (Pallas path).  x: (N, Cin, H, W) NCHW -> (N, Cout, 2H, 2W).
# ----------------------------------------------------------------------------
def deconv_forward(x_nchw, params, kernel_size, padding):
    wgt, bias = params["w"], params["b"]
    c_out, c_in, k, k2 = wgt.shape
    assert k == k2 == kernel_size
    p = padding

    n, cin, h, w_in = x_nchw.shape
    assert cin == c_in
    hu, wu = 2 * h, 2 * w_in                 # upsampled size
    hp, wp = hu + 2 * p, wu + 2 * p          # conv-padded size
    ho, wo = hp - k + 1, wp - k + 1          # conv output size
    wpa = ((wp + 127) // 128) * 128          # lane-aligned padded row pitch
    ch = c_in * h                            # rows of x2 / one dx block of S
    kk = k * ch                              # stage-2 contraction size

    # Interpolation operators.
    a_h = _bilinear_matrix(h, hu)            # (Hu, H)
    a_w = _bilinear_matrix(w_in, wu)         # (Wu, W)

    # Width operator: upsample + zero-pad into the lane-aligned pitch Wpa, with
    # the k dx-shifted copies concatenated along lanes -> (W, k*Wpa).
    aw_pad = jnp.pad(a_w.T, ((0, 0), (p, wpa - p - wu)))
    aw_cat = jnp.concatenate(
        [jnp.pad(aw_pad[:, dx:], ((0, 0), (0, dx))) for dx in range(k)], axis=1)

    # Height operator folded with the conv taps:
    #   Wfold[(o,y), (dx,c,h)] = sum_dy W[o,c,dy,dx] * Ah_pad[y+dy, h]
    ah_pad = jnp.pad(a_h, ((p, hp - p - hu), (0, 0)))                  # (Hp, H)
    ah_win = jnp.stack([ah_pad[dy:dy + ho] for dy in range(k)], axis=1)  # (Ho,k,H)
    wfold = jnp.einsum('ocij,yih->oyjch', wgt, ah_win)
    wfold = wfold.reshape(c_out * ho, kk).astype(MXU_DTYPE)

    x2 = x_nchw.reshape(n, ch, w_in)         # pure reshape, no copy
    b2d = bias.reshape(c_out, 1).astype(jnp.float32)

    kernel = functools.partial(_fused_deconv_kernel, k=k, wpa=wpa, ch=ch,
                               c_out=c_out, ho=ho, wo=wo)

    return pl.pallas_call(
        kernel,
        out_shape=jax.ShapeDtypeStruct((n, c_out, ho, wo), x_nchw.dtype),
        grid_spec=pltpu.PrefetchScalarGridSpec(
            num_scalar_prefetch=0,
            grid=(n,),
            in_specs=[
                pl.BlockSpec((None, ch, w_in), lambda i: (i, 0, 0)),
                pl.BlockSpec((w_in, k * wpa), lambda i: (0, 0)),
                pl.BlockSpec((c_out * ho, kk), lambda i: (0, 0)),
                pl.BlockSpec((c_out, 1), lambda i: (0, 0)),
            ],
            out_specs=pl.BlockSpec((None, c_out, ho, wo),
                                   lambda i: (i, 0, 0, 0)),
            scratch_shapes=[pltpu.VMEM((kk, wpa), MXU_DTYPE)],
        ),
        compiler_params=pltpu.CompilerParams(
            dimension_semantics=("parallel",),   # split batch across v7x's 2 TCs
        ),
    )(x2, aw_cat, wfold, b2d)


# ----------------------------------------------------------------------------
# Pure-JAX reference (independent gather-based upsample + XLA conv).
# ----------------------------------------------------------------------------
def _bilinear_upsample_x2_ref(x):
    n, c, h, w = x.shape
    ho, wo = 2 * h, 2 * w

    def grid_1d(size_in, size_out):
        pos = jnp.arange(size_out, dtype=jnp.float32) * (
            (size_in - 1) / (size_out - 1))
        i0 = jnp.floor(pos).astype(jnp.int32)
        i1 = jnp.minimum(i0 + 1, size_in - 1)
        frac = pos - i0.astype(jnp.float32)
        return i0, i1, frac

    y0, y1, fy = grid_1d(h, ho)
    x0, x1, fx = grid_1d(w, wo)
    xf = x.astype(jnp.float32)
    rows = (xf[:, :, y0, :] * (1.0 - fy)[None, None, :, None]
            + xf[:, :, y1, :] * fy[None, None, :, None])
    out = (rows[:, :, :, x0] * (1.0 - fx)[None, None, None, :]
           + rows[:, :, :, x1] * fx[None, None, None, :])
    return out.astype(x.dtype)


def deconv_reference(x_nchw, params, kernel_size, padding):
    w, b = params["w"], params["b"]
    x_up = _bilinear_upsample_x2_ref(x_nchw)
    y = lax.conv_general_dilated(
        x_up, w, window_strides=(1, 1),
        padding=((padding, padding), (padding, padding)),
        dimension_numbers=("NCHW", "OIHW", "NCHW"))
    return y + b[None, :, None, None]


def init_params(key, in_channels, out_channels, kernel_size):
    k1, k2 = jax.random.split(key)
    fan_in = in_channels * kernel_size * kernel_size
    bound = 1.0 / (fan_in ** 0.5)
    w = jax.random.uniform(
        k1, (out_channels, in_channels, kernel_size, kernel_size),
        minval=-bound, maxval=bound, dtype=jnp.float32)
    b = jax.random.uniform(
        k2, (out_channels,), minval=-bound, maxval=bound, dtype=jnp.float32)
    return {"w": w, "b": b}


if __name__ == "__main__":
    # deconv(input_channel=4, output_channel=8, kernel_size=3, padding=1)
    # on x of shape (N=2, Cin=4, H=16, W=16) -> upsample to 32x32 -> conv.
    in_channels, out_channels = 4, 8
    kernel_size, padding = 3, 1

    key = jax.random.PRNGKey(0)
    kx, kp = jax.random.split(key)
    x = jax.random.normal(kx, (2, in_channels, 16, 16), dtype=jnp.float32)
    params = init_params(kp, in_channels, out_channels, kernel_size)

    fwd = jax.jit(functools.partial(
        deconv_forward, kernel_size=kernel_size, padding=padding))
    out = jax.block_until_ready(fwd(x, params))

    ref = deconv_reference(x, params, kernel_size, padding)
    assert out.shape == ref.shape == (2, out_channels, 32, 32), (out.shape,
                                                                 ref.shape)
    max_err = float(jnp.max(jnp.abs(out - ref)))
    # bf16 MXU inputs on the conv dot -> bf16-appropriate tolerance
    # (MXU_DTYPE = jnp.float32 brings max_err to ~1e-5).
    assert jnp.allclose(out, ref, atol=3e-2, rtol=1e-2), max_err
    print("KERNEL_OK")
</pallas_src>

<mosaic_0001>
module attributes {stable_mosaic.version = 11 : i64} {
  func.func @_fused_deconv_kernel(%arg0: i32, %arg1: memref<1x64x16xf32, #tpu.memory_space<vmem>>, %arg2: memref<16x384xf32, #tpu.memory_space<vmem>>, %arg3: memref<256x192xbf16, #tpu.memory_space<vmem>>, %arg4: memref<8x1xf32, #tpu.memory_space<vmem>>, %arg5: memref<1x8x32x32xf32, #tpu.memory_space<vmem>>, %arg6: memref<192x128xbf16, #tpu.memory_space<vmem>>) attributes {dimension_semantics = [#tpu.dimension_semantics<parallel>], iteration_bounds = array<i64: 2>, scalar_prefetch = 0 : i64, scratch_operands = 1 : i64, tpu.core_type = #tpu.core_type<tc>, window_params = [{transform_indices = @transform_0, window_bounds = array<i64: 1, 64, 16>}, {pipeline_mode = #tpu.pipeline_mode<synchronous>, transform_indices = @transform_1, window_bounds = array<i64: 16, 384>}, {pipeline_mode = #tpu.pipeline_mode<synchronous>, transform_indices = @transform_2, window_bounds = array<i64: 256, 192>}, {pipeline_mode = #tpu.pipeline_mode<synchronous>, transform_indices = @transform_3, window_bounds = array<i64: 8, 1>}, {transform_indices = @transform_4, window_bounds = array<i64: 1, 8, 32, 32>}]} {
    %c0 = arith.constant 0 : index
    %c0_0 = arith.constant 0 : index
    %c0_1 = arith.constant 0 : index
    %0 = vector.load %arg1[%c0, %c0_0, %c0_1] : memref<1x64x16xf32, #tpu.memory_space<vmem>>, vector<1x64x16xf32>
    %1 = vector.shape_cast %0 : vector<1x64x16xf32> to vector<64x16xf32>
    %c0_2 = arith.constant 0 : index
    %c0_3 = arith.constant 0 : index
    %2 = vector.load %arg2[%c0_2, %c0_3] : memref<16x384xf32, #tpu.memory_space<vmem>>, vector<16x384xf32>
    %cst = arith.constant dense<0.000000e+00> : vector<64x384xf32>
    %3 = tpu.matmul %1, %2, %cst {dimension_numbers = #tpu.dot_dimension_numbers<[1], [0], [0], [1], [0, 0, 1, 1], [], []>} : vector<64x16xf32>, vector<16x384xf32>, vector<64x384xf32> -> vector<64x384xf32>
    %4 = vector.extract_strided_slice %3 {offsets = [0, 0], sizes = [64, 128], strides = [1, 1]} : vector<64x384xf32> to vector<64x128xf32>
    %5 = arith.truncf %4 : vector<64x128xf32> to vector<64x128xbf16>
    %c0_4 = arith.constant 0 : index
    %c0_5 = arith.constant 0 : index
    %6 = vector.load %arg6[%c0_4, %c0_5] : memref<192x128xbf16, #tpu.memory_space<vmem>>, vector<64x128xbf16>
    tpu.vector_store %arg6[%c0_4, %c0_5], %5 {strides = array<i32>} : memref<192x128xbf16, #tpu.memory_space<vmem>>, vector<64x128xbf16>,
    %7 = vector.extract_strided_slice %3 {offsets = [0, 128], sizes = [64, 128], strides = [1, 1]} : vector<64x384xf32> to vector<64x128xf32>
    %8 = arith.truncf %7 : vector<64x128xf32> to vector<64x128xbf16>
    %c64 = arith.constant 64 : index
    %c0_6 = arith.constant 0 : index
    %9 = vector.load %arg6[%c64, %c0_6] : memref<192x128xbf16, #tpu.memory_space<vmem>>, vector<64x128xbf16>
    tpu.vector_store %arg6[%c64, %c0_6], %8 {strides = array<i32>} : memref<192x128xbf16, #tpu.memory_space<vmem>>, vector<64x128xbf16>,
    %10 = vector.extract_strided_slice %3 {offsets = [0, 256], sizes = [64, 128], strides = [1, 1]} : vector<64x384xf32> to vector<64x128xf32>
    %11 = arith.truncf %10 : vector<64x128xf32> to vector<64x128xbf16>
    %c128 = arith.constant 128 : index
    %c0_7 = arith.constant 0 : index
    %12 = vector.load %arg6[%c128, %c0_7] : memref<192x128xbf16, #tpu.memory_space<vmem>>, vector<64x128xbf16>
    tpu.vector_store %arg6[%c128, %c0_7], %11 {strides = array<i32>} : memref<192x128xbf16, #tpu.memory_space<vmem>>, vector<64x128xbf16>,
    %c0_8 = arith.constant 0 : index
    %c0_9 = arith.constant 0 : index
    %13 = vector.load %arg3[%c0_8, %c0_9] : memref<256x192xbf16, #tpu.memory_space<vmem>>, vector<256x192xbf16>
    %c0_10 = arith.constant 0 : index
    %c0_11 = arith.constant 0 : index
    %14 = vector.load %arg6[%c0_10, %c0_11] : memref<192x128xbf16, #tpu.memory_space<vmem>>, vector<192x128xbf16>
    %cst_12 = arith.constant dense<0.000000e+00> : vector<256x128xf32>
    %15 = tpu.matmul %13, %14, %cst_12 {dimension_numbers = #tpu.dot_dimension_numbers<[1], [0], [0], [1], [0, 0, 1, 1], [], []>} : vector<256x192xbf16>, vector<192x128xbf16>, vector<256x128xf32> -> vector<256x128xf32>
    %16 = vector.shape_cast %15 : vector<256x128xf32> to vector<8x32x128xf32>
    %17 = vector.extract_strided_slice %16 {offsets = [0, 0, 0], sizes = [8, 32, 32], strides = [1, 1, 1]} : vector<8x32x128xf32> to vector<8x32x32xf32>
    %c0_13 = arith.constant 0 : index
    %c0_14 = arith.constant 0 : index
    %18 = vector.load %arg4[%c0_13, %c0_14] : memref<8x1xf32, #tpu.memory_space<vmem>>, vector<8x1xf32>
    %19 = vector.shape_cast %18 : vector<8x1xf32> to vector<8x1x1xf32>
    %20 = vector.broadcast %19 : vector<8x1x1xf32> to vector<8x32x32xf32>
    %21 = arith.addf %17, %20 : vector<8x32x32xf32>
    %c0_15 = arith.constant 0 : index
    %c0_16 = arith.constant 0 : index
    %c0_17 = arith.constant 0 : index
    %c0_18 = arith.constant 0 : index
    %22 = vector.load %arg5[%c0_15, %c0_16, %c0_17, %c0_18] : memref<1x8x32x32xf32, #tpu.memory_space<vmem>>, vector<1x8x32x32xf32>
    %23 = vector.shape_cast %22 : vector<1x8x32x32xf32> to vector<8x32x32xf32>
    %24 = vector.shape_cast %21 : vector<8x32x32xf32> to vector<1x8x32x32xf32>
    tpu.vector_store %arg5[%c0_15, %c0_16, %c0_17, %c0_18], %24 {strides = array<i32>} : memref<1x8x32x32xf32, #tpu.memory_space<vmem>>, vector<1x8x32x32xf32>,
    return
  }
  func.func @transform_0(%arg0: i32) -> (i32, i32, i32) {
    %c0_i32 = arith.constant 0 : i32
    %c0_i32_0 = arith.constant 0 : i32
    %c0_i32_1 = arith.constant 0 : i32
    return %arg0, %c0_i32, %c0_i32_0 : i32, i32, i32
  }
  func.func @transform_1(%arg0: i32) -> (i32, i32) {
    %c0_i32 = arith.constant 0 : i32
    %c0_i32_0 = arith.constant 0 : i32
    %c0_i32_1 = arith.constant 0 : i32
    return %c0_i32, %c0_i32_0 : i32, i32
  }
  func.func @transform_2(%arg0: i32) -> (i32, i32) {
    %c0_i32 = arith.constant 0 : i32
    %c0_i32_0 = arith.constant 0 : i32
    %c0_i32_1 = arith.constant 0 : i32
    return %c0_i32, %c0_i32_0 : i32, i32
  }
  func.func @transform_3(%arg0: i32) -> (i32, i32) {
    %c0_i32 = arith.constant 0 : i32
    %c0_i32_0 = arith.constant 0 : i32
    %c0_i32_1 = arith.constant 0 : i32
    return %c0_i32, %c0_i32_0 : i32, i32
  }
  func.func @transform_4(%arg0: i32) -> (i32, i32, i32, i32) {
    %c0_i32 = arith.constant 0 : i32
    %c0_i32_0 = arith.constant 0 : i32
    %c0_i32_1 = arith.constant 0 : i32
    %c0_i32_2 = arith.constant 0 : i32
    return %arg0, %c0_i32, %c0_i32_0, %c0_i32_1 : i32, i32, i32, i32
  }
}

</mosaic_0001>

<bundles_post_ra>
// kernel: deconv_forward.1
= control target key start
LH: loop header
LB: loop body
LE: loop exit
PB: predicated region body
PF: predicated region fallthrough
CT: control target
= control target key end

     0   :  { %9 = vsyncpa [#allocation4], 0  ;;  %s1829_s0 = inlined_call_operand.vmem [shape: f32[2,64,16], index: 0, kind: input, shape index: {}]   ;;  %s1830_s1 = inlined_call_operand.vmem [shape: f32[16,384], index: 1, kind: input, shape index: {}]   ;;  %s1831_s2 = inlined_call_operand.vmem [shape: bf16[256,192], index: 2, kind: input, shape index: {}]   ;;  %s1832_s3 = inlined_call_operand.vmem [shape: f32[8,1], index: 3, kind: input, shape index: {}]   ;;  %s1833_s4 = inlined_call_operand.hbm [shape: f32[2,8,32,32], index: 4, kind: output, shape index: {}]  }
   0x1   :  { %11 = vsyncpa [#allocation4 + $0x1], 0  ;;  %s1458_s15 = smov 0   ;;  %s1460_s16 = smov 0  }
   0x2   :  { %s1462_s17 = smov 0   ;;  %s1464_s18 = smov 0  }
   0x3 LB: > { %s1479_s19 = sadd.s32 4294967295, %s1425_s18   ;;  %s1132_s20 = sadd.s32 4294967294, %s1425_s18   ;;  %s1425_s18 = sphi %s1464_s18, %s1839_s18   ;;  %s1421_s17 = sphi %s1462_s17, %s1838_s17   ;;  %s1417_s16 = sphi %s1460_s16, %s1837_s16   ;;  %s1413_s15 = sphi %s1458_s15, %s1836_s15  }
   0x4   : > { %s1483_s21 = sadd.s32 1, %s1425_s18   ;;  %s113_s22 = sadd.s32 1, %s1421_s17 }
   0x5   : > { %s110_s23 = ssub.s32 %s1425_s18, %s1483_s21  ;;  %p123_p0 = scmp.ne.s32.totalorder %s1421_s17, %s1417_s16 }
   0x6   : > { %p111_p1 = scmp.eq.s32.totalorder %s110_s23, 0  ;;  %p124_p2 = scmp.eq.s32.totalorder %s1479_s19, 1 }
   0x7   : > { %p129_p3 = scmp.ne.s32.totalorder %s1417_s16, %s1413_s15  ;;  %p130_p4 = scmp.eq.s32.totalorder %s1132_s20, 1 }
   0x8   : > { %s1494_s24 = scalar_select %p111_p1, %s1421_s17, %s113_s22  }
   0x9   : > { %p1496_p5 = por %p124_p2, %p123_p0  ;;  %p1500_p6 = por %p130_p4, %p129_p3 }
   0xa   : > { %p1135_p7 = scmp.ge.s32.totalorder %s1425_s18, 1  ;;  %p165_p8 = scmp.lt.s32.totalorder %s1425_s18, 3 }
   0xc   : > { %p166_p9 = pnand %p1135_p7, %p165_p8 }
   0xd   : > { %v206_v0 = vld [vmem:[%s1830_s1 + $0x8] sm:$0xff] (!%p166_p9)  ;;  %v209_v1 = vld [vmem:[%s1830_s1 + $0x20] sm:$0xff] (!%p166_p9)  ;;  %p191_p10 = scmp.lt.s32.totalorder (!%p166_p9), %s1479_s19, 1  ;;  %v208_v4 = vld [vmem:[%s1830_s1 + $0x18] sm:$0xff] (!%p166_p9)  ;;  %v1427_v5 = vmov (!%p166_p9), 0.0   ;;  %vm211_vm0 = vcmask (!%p166_p9), 130048   ;;  %v882_v21 = vlaneseq (!%p166_p9) }
   0xe   : > { %169 = sbr.rel (%p166_p9) target bundleno = 590 (0x24e), region = 36  ;;  %v205_v2 = vld [vmem:[%s1830_s1] sm:$0xff] (!%p166_p9)  ;;  %v1236_v3 = vpack.c.bf16 (!%p166_p9), %v209_v1, %v206_v0  ;;  %300 = vmatprep.mubr.f32.mxu0 (!%p166_p9), %v1427_v5  ;;  %v207_v6 = vld [vmem:[%s1830_s1 + $0x10] sm:$0xff] (!%p166_p9)  ;;  %v210_v7 = vld [vmem:[%s1830_s1 + $0x28] sm:$0xff] (!%p166_p9)  ;;  %v1428_v18 = vmov (!%p166_p9), 0   ;;  %vm666_vm1 = vcmask (!%p166_p9), 523264  }
   0xf   : > { %v1238_v8 = vpack.c.bf16 (!%p166_p9), %v208_v4, %v205_v2  ;;  %v1240_v9 = vpack.c.bf16 (!%p166_p9), %v210_v7, %v207_v6  ;;  %1312 = vset.pattern.permute.xlu0 (!%p166_p9), %v1428_v18  ;;  %1313 = vset.pattern.permute.xlu1 (!%p166_p9), %v1428_v18  ;;  %v1316_v19 = vld [vmem:[%s1831_s2 + $0x4] ss:$8 sps:$4 sm:$0xff] (!%p166_p9)   ;;  %v1429_v22 = vmov (!%p166_p9), 1966171168   ;;  %v883_v25 = vshrl.u32 (!%p166_p9), %v882_v21, 7  ;;  %s188_s22 = sand.u32 (!%p166_p9), 1, %s1417_s16  }
  0x10   : > { %1237 = vmatprep.subr.bf16.mxu0 (!%p166_p9), %v1236_v3  ;;  %v1319_v20 = vld [vmem:[%s1831_s2 + $0x84] ss:$8 sps:$4 sm:$0xff] (!%p166_p9)   ;;  %v880_v23 = vunpack.c.l.s4 (!%p166_p9), %v1429_v22  ;;  %vm1023_vm2 = vcmask (!%p166_p9), 261120   ;;  %s1209_s28 = sshll.u32 (!%p166_p9), %s1479_s19, 12  ;;  %s1430_s8 = smov (!%p166_p9), [#allocation3]  }
  0x11   : > { %1239 = vmatpush1.bf16.msra.mxu0 (!%p166_p9), %v1238_v8  ;;  %1241 = vmatprep.subr.bf16.mxu1 (!%p166_p9), %v1240_v9  ;;  %v876_v24 = vld [vmem:[%s1832_s3] sm:$0xff] (!%p166_p9)  ;;  %v929_v33 = vsub.s32 (!%p166_p9), 0, %v883_v25  ;;  %s1774_s6 = scalar_lea.hbm (!%p166_p9), %s1833_s4, %s1209_s28  ;;  %s1367_s9 = sshll.u32 (!%p166_p9), %s1430_s8, 4  ;;  %s1368_s9 = int_to_ptr.vmem [resolvable:$false] %s1367_s9 }
  0x12   : > { %1243 = vmatpush3.bf16.msra.mxu1 (!%p166_p9), %v1240_v9  ;;  %715 = vmatprep.subr.bf16.mxu0 (!%p166_p9), %v1428_v18  ;;  %v878_v26 = vcombine.high (!%p166_p9), %v876_v24, %v876_v24  ;;  %v881_v27 = vunpack.c.0.s8 (!%p166_p9), %v880_v23  ;;  %v1314_v23 = vld [vmem:[%s1831_s2] ss:$8 sps:$4 sm:$0xff] (!%p166_p9)   ;;  %s1369_s10 = scalar_lea.vmem (!%p166_p9), %s1368_s9, 8192 }
  0x13   : > { %1244 = vmatprep.subr.bf16.mxu1 (!%p166_p9), %v1428_v18 }
  0x14   : > { %v884_v28 = vsub.s32 (!%p166_p9), %v881_v27, %v883_v25  ;;  %v1320_v25 = vld [vmem:[%s1831_s2 + $0x14] ss:$8 sps:$4 sm:$0xff] (!%p166_p9)   ;;  %v1325_v27 = vld [vmem:[%s1831_s2 + $0x90] ss:$8 sps:$4 sm:$0xff] (!%p166_p9)  }
  0x15   : > { %s192_s13 = scalar_select %p191_p10, %s1479_s19, 1 }
  0x16   : > { %v885_v32 = vrot.slane %v876_v24, %v884_v28  ;;  %v892_v34 = vrot.slane %v878_v26, %v884_v28  ;;  %v1317_v24 = vld [vmem:[%s1831_s2 + $0x80] ss:$8 sps:$4 sm:$0xff]   ;;  %v1322_v26 = vld [vmem:[%s1831_s2 + $0x94] ss:$8 sps:$4 sm:$0xff]   ;;  %s1788_s19 = scalar_lea.sflag [#allocation4], %s188_s22 }
  0x17   : > { %s1208_s14 = sshll.u32 %s192_s13, 6 }
  0x18   : > { %s195_s23 = scalar_lea.vmem %s1829_s0, %s1208_s14  ;;  %v893_v37 = vcombine.high %v885_v32, %v885_v32  ;;  %v901_v38 = vrot.slane %v885_v32, %v884_v28  ;;  %v894_v40 = vcombine.high %v892_v34, %v892_v34  ;;  %v908_v45 = vrot.slane %v892_v34, %v884_v28  ;;  %v1332_v32 = vld [vmem:[%s1831_s2 + $0x34] ss:$8 sps:$4 sm:$0xff]   ;;  %v1336_v34 = vld [vmem:[%s1831_s2 + $0x30] ss:$8 sps:$4 sm:$0xff]  }
  0x19   : > { %v197_v10 = vld [vmem:[%s195_s23] sm:$0xff]  ;;  %v198_v11 = vld [vmem:[%s195_s23 + $0x8] sm:$0xff]  ;;  %v199_v12 = vld [vmem:[%s195_s23 + $0x10] sm:$0xff] }
  0x1a   : > { %1139 = vmatmul.mubr.msk.f32.vlgmr.msra.gmra.mrb[0].mxu0 %vm211_vm0, %v197_v10  ;;  %1224 = vmatprep.mubr.msk.f32.mxu1 %vm211_vm0, %v197_v10  ;;  %v200_v13 = vld [vmem:[%s195_s23 + $0x18] sm:$0xff]  ;;  %v201_v14 = vld [vmem:[%s195_s23 + $0x20] sm:$0xff]  ;;  %v202_v15 = vld [vmem:[%s195_s23 + $0x28] sm:$0xff]  ;;  %v930_v44 = vrot.slane %v901_v38, %v929_v33  ;;  %v923_v46 = vcombine.high %v901_v38, %v901_v38  ;;  %v922_v49 = vrot.slane %v894_v40, %v884_v28 }
  0x1b   : > { %306 = vmatprep.mubr.f32.mxu0 %v1427_v5  ;;  %1225 = vmatmul.mubr.msk.f32.vlgmr.msra.gmra.mrb[0].mxu1 %vm211_vm0, %v198_v11  ;;  %v203_v16 = vld [vmem:[%s195_s23 + $0x30] sm:$0xff]  ;;  %v204_v17 = vld [vmem:[%s195_s23 + $0x38] sm:$0xff]  ;;  %v915_v52 = vrot.slane %v893_v37, %v884_v28  ;;  %v946_v56 = vrot.slane %v908_v45, %v929_v33  ;;  %v924_v63 = vcombine.high %v908_v45, %v908_v45  ;;  %v1326_v28 = vld [vmem:[%s1831_s2 + $0x24] ss:$8 sps:$4 sm:$0xff]   ;;  %s1136_s23 = sshll.u32 %s188_s22, 8 }
  0x1c   : > { %1227 = vmatprep.mubr.msk.f32.mxu1 %vm211_vm0, %v199_v12  ;;  %v938_v51 = vrot.slane %v923_v46, %v929_v33  ;;  %960 = vperm.xlu0 %1312, %v930_v44   ;;  %v950_v57 = vrot.slane %v922_v49, %v929_v33  ;;  %v926_v4 = vcombine.high %v922_v49, %v922_v49  ;;  %v1340_v37 = vld [vmem:[%s1831_s2 + $0xc4] ss:$8 sps:$4 sm:$0xff]   ;;  %v1342_v38 = vld [vmem:[%s1831_s2 + $0x40] ss:$8 sps:$4 sm:$0xff]   ;;  %v1344_v40 = vld [vmem:[%s1831_s2 + $0x54] ss:$8 sps:$4 sm:$0xff]  }
  0x1d   : > { %v925_v58 = vcombine.high %v915_v52, %v915_v52  ;;  %v934_v62 = vrot.slane %v915_v52, %v929_v33  ;;  %v954_v10 = vrot.slane %v924_v63, %v929_v33  ;;  %v1350_v44 = vld [vmem:[%s1831_s2 + $0x64] ss:$8 sps:$4 sm:$0xff]   ;;  %v1354_v46 = vld [vmem:[%s1831_s2 + $0x60] ss:$8 sps:$4 sm:$0xff]   ;;  %v1358_v49 = vld [vmem:[%s1831_s2 + $0xf4] ss:$8 sps:$4 sm:$0xff]  }
  0x1e   : > { %1140 = vmatmul.mubr.msk.f32.gmra.mrb[2].mxu0 %vm211_vm0, %v198_v11  ;;  %968 = vperm.xlu1 %1313, %v938_v51   ;;  %v958_v11 = vrot.slane %v926_v4, %v929_v33  ;;  %v1352_v45 = vld [vmem:[%s1831_s2 + $0xe4] ss:$8 sps:$4 sm:$0xff]   ;;  %v1361_v51 = vld [vmem:[%s1831_s2 + $0xf0] ss:$8 sps:$4 sm:$0xff]   ;;  %s1705_s27 = scalar_lea.vmem [#allocation3], %s1136_s23 }
  0x1f   : > { %312 = vmatprep.mubr.f32.mxu0 %v1427_v5  ;;  %1228 = vmatmul.mubr.msk.f32.gmra.mrb[2].mxu1 %vm211_vm0, %v200_v13  ;;  %v942_v3 = vrot.slane %v925_v58, %v929_v33  ;;  %v1334_v33 = vld [vmem:[%s1831_s2 + $0xb4] ss:$8 sps:$4 sm:$0xff]   ;;  %s1070_s29 = sshll.u32 %s1705_s27, 4  ;;  %s1776_s29 = int_to_ptr.vmem [resolvable:$true] %s1070_s29 }
  0x20   : > { %1230 = vmatprep.mubr.msk.f32.mxu1 %vm211_vm0, %v201_v14  ;;  %976 = vperm.xlu0 %1312, %v946_v56   ;;  %s1363_s7 = scalar_lea.vmem %s1776_s29, 4096  ;;  %p1370_p0 = scmp.lt.s32.totalorder %s1776_s29, %s1368_s9 }
  0x21   : > { %p1364_p11 = scmp.ne.s32.totalorder %s1776_s29, %s1363_s7  ;;  %p1371_p1 = scmp.lt.s32.totalorder %s1369_s10, %s1363_s7 }
  0x22   : > { %1141 = vmatmul.mubr.msk.f32.gmra.mrb[4].mxu0 %vm211_vm0, %v199_v12  ;;  %980 = vperm.xlu1 %1313, %v950_v57  }
  0x23   : > { %318 = vmatprep.mubr.f32.mxu0 %v1427_v5  ;;  %1231 = vmatmul.mubr.msk.f32.gmra.mrb[4].mxu1 %vm211_vm0, %v202_v15  ;;  %p1365_p12 = pnand %p1364_p11, %p1496_p5  ;;  %p1372_p2 = por %p1371_p1, %p1370_p0 }
  0x24   : > { %1233 = vmatprep.mubr.msk.f32.mxu1 %vm211_vm0, %v203_v16  ;;  %964 = vperm.xlu0 %1312, %v934_v62  }
  0x25   : > { %p1366_p13 = pneg %p1365_p12 }
  0x26   : > { %1142 = vmatmul.mubr.msk.f32.gmra.mrb[6].mxu0 %vm211_vm0, %v200_v13  ;;  %972 = vperm.xlu1 %1313, %v942_v3  }
  0x27   : > { %324 = vmatprep.mubr.f32.mxu0 %v1427_v5  ;;  %1234 = vmatmul.mubr.msk.f32.gmra.mrb[6].mxu1 %vm211_vm0, %v204_v17  ;;  %p1373_p3 = pnand %p1372_p2, %p1366_p13 }
  0x28   : > { %1195 = vmatprep.mubr.msk.bf16.mxu1 %vm666_vm1, %v1319_v20  ;;  %984 = vperm.xlu0 %1312, %v954_v10  }
  0x2a   : > { %1143 = vmatmul.mubr.msk.f32.gmra.mrb[8].mxu0 %vm211_vm0, %v201_v14  ;;  %988 = vperm.xlu1 %1313, %v958_v11  }
  0x2b   : > { %330 = vmatprep.mubr.f32.mxu0 %v1427_v5 }
  0x2e   : > { %1144 = vmatmul.mubr.msk.f32.gmra.mrb[10].mxu0 %vm211_vm0, %v202_v15 }
  0x2f   : > { %336 = vmatprep.mubr.f32.mxu0 %v1427_v5 }
  0x32   : > { %1145 = vmatmul.mubr.msk.f32.gmra.mrb[12].mxu0 %vm211_vm0, %v203_v16 }
  0x33   : > { %342 = vmatprep.mubr.f32.mxu0 %v1427_v5 }
  0x36   : > { %1146 = vmatmul.mubr.msk.f32.gmra.mrb[14].mxu0 %vm211_vm0, %v204_v17 }
  0x37   : > { %1187 = vmatprep.mubr.msk.bf16.mxu0 %vm666_vm1, %v1316_v19 }
  0x9b   : > { %v961_v52 = vpop.permute.xlu0 %960 }
  0xed   : > { %v302_v29 = vpop.f32.mrb[0].mxu0 }
  0xee   : > { %v304_v30 = vpop.f32.mrb[1].mxu0  ;;  %v1226_v31 = vpop.f32.mrb[0].mxu1 }
  0xef   : > { %v415_v35 = vpop.f32.mrb[1].mxu1 }
  0xf0   : > { %v1560_v36 = vpack.c.bf16 %v1226_v31, %v415_v35  ;;  %v1331_v31 = vld [vmem:[%s1831_s2 + $0xa0] ss:$8 sps:$4 sm:$0xff]   ;;  %v1337_v35 = vld [vmem:[%s1831_s2 + $0xb0] ss:$8 sps:$4 sm:$0xff]  }
  0xf1   : > { %v308_v39 = vpop.f32.mrb[2].mxu0 }
  0xf2   : > { %v454_v41 = vpack.c.bf16 %v308_v39, %v302_v29  ;;  %v310_v42 = vpop.f32.mrb[3].mxu0  ;;  %v1229_v43 = vpop.f32.mrb[2].mxu1  ;;  %v1328_v29 = vld [vmem:[%s1831_s2 + $0xa4] ss:$8 sps:$4 sm:$0xff]   ;;  %v1343_v39 = vld [vmem:[%s1831_s2 + $0xc0] ss:$8 sps:$4 sm:$0xff]  }
  0xf3   : > { %v1562_v47 = vpack.c.bf16 %v310_v42, %v304_v30  ;;  %v425_v48 = vpop.f32.mrb[3].mxu1  ;;  %v1330_v30 = vld [vmem:[%s1831_s2 + $0x20] ss:$8 sps:$4 sm:$0xff]   ;;  %v1348_v42 = vld [vmem:[%s1831_s2 + $0x50] ss:$8 sps:$4 sm:$0xff]  }
  0xf4   : > { %716 = vmatpush1.bf16.msra.mxu0 %v454_v41  ;;  %1256 = vmatpush1.bf16.msra.mxu1 %v454_v41  ;;  %v1564_v50 = vpack.c.bf16 %v1229_v43, %v425_v48  ;;  %v1346_v41 = vld [vmem:[%s1831_s2 + $0xd4] ss:$8 sps:$4 sm:$0xff]   ;;  %v1349_v43 = vld [vmem:[%s1831_s2 + $0xd0] ss:$8 sps:$4 sm:$0xff]  }
  0xf5   : > { %v314_v53 = vpop.f32.mrb[4].mxu0  ;;  %717 = vmatprep.subr.bf16.mxu0 %v1428_v18  ;;  %1245 = vmatprep.subr.bf16.mxu1 %v1428_v18  ;;  %v1356_v48 = vld [vmem:[%s1831_s2 + $0x74] ss:$8 sps:$4 sm:$0xff]  }
  0xf6   : > { %v316_v54 = vpop.f32.mrb[5].mxu0  ;;  %v1232_v55 = vpop.f32.mrb[4].mxu1 }
  0xf7   : > { %v435_v59 = vpop.f32.mrb[5].mxu1 }
  0xf8   : > { %v1568_v60 = vpack.c.bf16 %v1232_v55, %v435_v59 }
  0xf9   : > { %v320_v61 = vpop.f32.mrb[6].mxu0 }
  0xfa   : > { %v455_v0 = vpack.c.bf16 %v320_v61, %v314_v53  ;;  %v322_v1 = vpop.f32.mrb[7].mxu0  ;;  %v1235_v2 = vpop.f32.mrb[6].mxu1 }
  0xfb   : > { %v463_v5 = vpack.c.bf16 %v322_v1, %v316_v54  ;;  %v445_v6 = vpop.f32.mrb[7].mxu1  ;;  %v977_v53 = vpop.permute.xlu0 %976 }
  0xfc   : > { %718 = vmatpush1.bf16.msra.mxu0 %v455_v0  ;;  %1257 = vmatpush1.bf16.msra.mxu1 %v455_v0  ;;  %v473_v7 = vpack.c.bf16 %v1235_v2, %v445_v6  ;;  %v1715_v2 = vpop.permute.xlu1 %968 }
  0xfd   : > { %v326_v8 = vpop.f32.mrb[8].mxu0  ;;  %719 = vmatprep.subr.bf16.mxu0 %v1428_v18  ;;  %1246 = vmatprep.subr.bf16.mxu1 %v1428_v18 }
  0xfe   : > { %v328_v9 = vpop.f32.mrb[9].mxu0 }
 0x101   : > { %v332_v12 = vpop.f32.mrb[10].mxu0 }
 0x102   : > { %v456_v13 = vpack.c.bf16 %v332_v12, %v326_v8  ;;  %v334_v14 = vpop.f32.mrb[11].mxu0 }
 0x103   : > { %v464_v15 = vpack.c.bf16 %v334_v14, %v328_v9 }
 0x104   : > { %720 = vmatpush1.bf16.msra.mxu0 %v456_v13  ;;  %1258 = vmatpush1.bf16.msra.mxu1 %v456_v13 }
 0x105   : > { %v338_v16 = vpop.f32.mrb[12].mxu0  ;;  %721 = vmatprep.subr.bf16.mxu0 %v1428_v18  ;;  %1247 = vmatprep.subr.bf16.mxu1 %v1428_v18 }
 0x106   : > { %v340_v17 = vpop.f32.mrb[13].mxu0 }
 0x109   : > { %v344_v19 = vpop.f32.mrb[14].mxu0 }
 0x10a   : > { %v457_v20 = vpack.c.bf16 %v344_v19, %v338_v16  ;;  %v346_v21 = vpop.f32.mrb[15].mxu0  ;;  %v965_v16 = vpop.permute.xlu0 %964 }
 0x10b   : > { %v465_v22 = vpack.c.bf16 %v346_v21, %v340_v17 }
 0x10c   : > { %722 = vmatpush1.bf16.msra.mxu0 %v457_v20  ;;  %1259 = vmatpush1.bf16.msra.mxu1 %v457_v20 }
 0x10d   : > { %723 = vmatprep.subr.bf16.mxu0 %v1428_v18  ;;  %1248 = vmatprep.subr.bf16.mxu1 %v1428_v18 }
 0x110   : > { %724 = vmatpush1.bf16.msra.mxu0 %v1562_v47  ;;  %1260 = vmatpush1.bf16.msra.mxu1 %v1562_v47  ;;  %v1355_v47 = vld [vmem:[%s1831_s2 + $0xe0] ss:$8 sps:$4 sm:$0xff]  }
 0x111   : > { %725 = vmatprep.subr.bf16.mxu0 %v1428_v18  ;;  %1249 = vmatprep.subr.bf16.mxu1 %v1428_v18 }
 0x114   : > { %726 = vmatpush1.bf16.msra.mxu0 %v463_v5  ;;  %1261 = vmatpush1.bf16.msra.mxu1 %v463_v5 }
 0x115   : > { %727 = vmatprep.subr.bf16.mxu0 %v1428_v18  ;;  %1250 = vmatprep.subr.bf16.mxu1 %v1428_v18 }
 0x118   : > { %728 = vmatpush1.bf16.msra.mxu0 %v464_v15  ;;  %1262 = vmatpush1.bf16.msra.mxu1 %v464_v15  ;;  %v981_v15 = vpop.permute.xlu1 %980 }
 0x119   : > { %729 = vmatprep.subr.bf16.mxu0 %v1428_v18  ;;  %1251 = vmatprep.subr.bf16.mxu1 %v1428_v18 }
 0x11c   : > { %730 = vmatpush1.bf16.msra.mxu0 %v465_v22  ;;  %1263 = vmatpush1.bf16.msra.mxu1 %v465_v22 }
 0x11d   : > { %731 = vmatprep.subr.bf16.mxu0 %v1428_v18  ;;  %1252 = vmatprep.subr.bf16.mxu1 %v1428_v18 }
 0x120   : > { %732 = vmatpush1.bf16.msra.mxu0 %v1560_v36  ;;  %1264 = vmatpush1.bf16.msra.mxu1 %v1560_v36  ;;  %v1338_v36 = vld [vmem:[%s1831_s2 + $0x44] ss:$8 sps:$4 sm:$0xff]  }
 0x121   : > { %733 = vmatprep.subr.bf16.mxu0 %v1428_v18  ;;  %1253 = vmatprep.subr.bf16.mxu1 %v1428_v18 }
 0x124   : > { %734 = vmatpush1.bf16.msra.mxu0 %v1564_v50  ;;  %1265 = vmatpush1.bf16.msra.mxu1 %v1564_v50  ;;  %v1360_v50 = vld [vmem:[%s1831_s2 + $0x70] ss:$8 sps:$4 sm:$0xff]  }
 0x125   : > { %735 = vmatprep.subr.bf16.mxu0 %v1428_v18  ;;  %1254 = vmatprep.subr.bf16.mxu1 %v1428_v18 }
 0x128   : > { %736 = vmatpush1.bf16.msra.mxu0 %v1568_v60  ;;  %1266 = vmatpush1.bf16.msra.mxu1 %v1568_v60 }
 0x129   : > { %737 = vmatprep.subr.bf16.mxu0 %v1428_v18  ;;  %1255 = vmatprep.subr.bf16.mxu1 %v1428_v18  ;;  %v1324_v18 = vld [vmem:[%s1831_s2 + $0x10] ss:$8 sps:$4 sm:$0xff]  }
 0x12c   : > { %738 = vmatpush1.bf16.msra.mxu0 %v473_v7  ;;  %1267 = vmatpush1.bf16.msra.mxu1 %v473_v7 }
 0x12f   : > { %748 = vmatmul.mubr.bf16.vlgmr.msra.gmra.mrb[16].mxu0 %v1314_v23  ;;  %812 = vmatmul.mubr.bf16.vlgmr.msra.gmra.mrb[8].mxu1 %v1317_v24 }
 0x130   : > { %1188 = vmatprep.mubr.msk.bf16.mxu0 %vm666_vm1, %v1320_v25  ;;  %1196 = vmatprep.mubr.msk.bf16.mxu1 %vm666_vm1, %v1322_v26 }
 0x137   : > { %756 = vmatmul.mubr.bf16.gmra.mrb[20].mxu0 %v1324_v18  ;;  %820 = vmatmul.mubr.bf16.gmra.mrb[12].mxu1 %v1325_v27 }
 0x138   : > { %1189 = vmatprep.mubr.msk.bf16.mxu0 %vm666_vm1, %v1326_v28  ;;  %1197 = vmatprep.mubr.msk.bf16.mxu1 %vm666_vm1, %v1328_v29 }
 0x13f   : > { %764 = vmatmul.mubr.bf16.gmra.mrb[24].mxu0 %v1330_v30  ;;  %828 = vmatmul.mubr.bf16.gmra.mrb[16].mxu1 %v1331_v31 }
 0x140   : > { %1190 = vmatprep.mubr.msk.bf16.mxu0 %vm666_vm1, %v1332_v32  ;;  %1198 = vmatprep.mubr.msk.bf16.mxu1 %vm666_vm1, %v1334_v33 }
 0x147   : > { %772 = vmatmul.mubr.bf16.gmra.mrb[28].mxu0 %v1336_v34  ;;  %836 = vmatmul.mubr.bf16.gmra.mrb[20].mxu1 %v1337_v35 }
 0x148   : > { %1191 = vmatprep.mubr.msk.bf16.mxu0 %vm666_vm1, %v1338_v36  ;;  %1199 = vmatprep.mubr.msk.bf16.mxu1 %vm666_vm1, %v1340_v37 }
 0x14f   : > { %780 = vmatmul.mubr.bf16.gmra.mrb[32].mxu0 %v1342_v38  ;;  %844 = vmatmul.mubr.bf16.gmra.mrb[24].mxu1 %v1343_v39 }
 0x150   : > { %1192 = vmatprep.mubr.msk.bf16.mxu0 %vm666_vm1, %v1344_v40  ;;  %1200 = vmatprep.mubr.msk.bf16.mxu1 %vm666_vm1, %v1346_v41  ;;  %v985_v41 = vpop.permute.xlu0 %984 }
 0x157   : > { %788 = vmatmul.mubr.bf16.gmra.mrb[36].mxu0 %v1348_v42  ;;  %852 = vmatmul.mubr.bf16.gmra.mrb[28].mxu1 %v1349_v43 }
 0x158   : > { %1193 = vmatprep.mubr.msk.bf16.mxu0 %vm666_vm1, %v1350_v44  ;;  %1201 = vmatprep.mubr.msk.bf16.mxu1 %vm666_vm1, %v1352_v45 }
 0x15f   : > { %796 = vmatmul.mubr.bf16.gmra.mrb[40].mxu0 %v1354_v46  ;;  %860 = vmatmul.mubr.bf16.gmra.mrb[32].mxu1 %v1355_v47 }
 0x160   : > { %1194 = vmatprep.mubr.msk.bf16.mxu0 %vm666_vm1, %v1356_v48  ;;  %1202 = vmatprep.mubr.msk.bf16.mxu1 %vm666_vm1, %v1358_v49 }
 0x167   : > { %804 = vmatmul.mubr.bf16.gmra.mrb[44].mxu0 %v1360_v50  ;;  %868 = vmatmul.mubr.bf16.gmra.mrb[36].mxu1 %v1361_v51 }
 0x202   : > { %v749_v54 = vpop.f32.mrb[16].mxu0  ;;  %v813_v55 = vpop.f32.mrb[8].mxu1 }
 0x203   : > { %v991_v56 = vadd.f32 %v961_v52, %v749_v54  ;;  %v1007_v57 = vadd.f32 %v977_v53, %v813_v55  ;;  %v751_v58 = vpop.f32.mrb[17].mxu0  ;;  %v815_v59 = vpop.f32.mrb[9].mxu1 }
 0x204   : > { %v752_v60 = vpop.f32.mrb[18].mxu0  ;;  %v816_v61 = vpop.f32.mrb[10].mxu1 }
 0x205   : > { %1024 = vst.msk [vmem:[%s1705_s27] sm:$0xff] %vm1023_vm2, %v991_v56  ;;  %1040 = vst.msk [vmem:[%s1705_s27 + $0x80] sm:$0xff] %vm1023_vm2, %v1007_v57  ;;  %v992_v62 = vadd.f32 %v961_v52, %v752_v60  ;;  %v1008_v63 = vadd.f32 %v977_v53, %v816_v61  ;;  %v754_v0 = vpop.f32.mrb[19].mxu0  ;;  %v818_v1 = vpop.f32.mrb[11].mxu1 }
 0x206   : > { %v973_v54 = vpop.permute.xlu1 %972 }
 0x207   : > { %1025 = vst.msk [vmem:[%s1705_s27 + $0x8] sm:$0xff] %vm1023_vm2, %v992_v62  ;;  %1041 = vst.msk [vmem:[%s1705_s27 + $0x88] sm:$0xff] %vm1023_vm2, %v1008_v63 }
 0x20a   : > { %v757_v3 = vpop.f32.mrb[20].mxu0  ;;  %v821_v4 = vpop.f32.mrb[12].mxu1 }
 0x20b   : > { %v993_v5 = vadd.f32 %v961_v52, %v757_v3  ;;  %v1009_v6 = vadd.f32 %v977_v53, %v821_v4  ;;  %v759_v7 = vpop.f32.mrb[21].mxu0  ;;  %v823_v8 = vpop.f32.mrb[13].mxu1 }
 0x20c   : > { %v760_v9 = vpop.f32.mrb[22].mxu0  ;;  %v824_v10 = vpop.f32.mrb[14].mxu1 }
 0x20d   : > { %1026 = vst.msk [vmem:[%s1705_s27 + $0x10] sm:$0xff] %vm1023_vm2, %v993_v5  ;;  %1042 = vst.msk [vmem:[%s1705_s27 + $0x90] sm:$0xff] %vm1023_vm2, %v1009_v6  ;;  %v994_v11 = vadd.f32 %v961_v52, %v760_v9  ;;  %v1010_v12 = vadd.f32 %v977_v53, %v824_v10  ;;  %v762_v13 = vpop.f32.mrb[23].mxu0  ;;  %v826_v14 = vpop.f32.mrb[15].mxu1 }
 0x20e   : > { %v989_v4 = vpop.permute.xlu1 %988 }
 0x20f   : > { %1027 = vst.msk [vmem:[%s1705_s27 + $0x18] sm:$0xff] %vm1023_vm2, %v994_v11  ;;  %1043 = vst.msk [vmem:[%s1705_s27 + $0x98] sm:$0xff] %vm1023_vm2, %v1010_v12 }
 0x212   : > { %v765_v17 = vpop.f32.mrb[24].mxu0  ;;  %v829_v19 = vpop.f32.mrb[16].mxu1 }
 0x213   : > { %v995_v20 = vadd.f32 %v965_v16, %v765_v17  ;;  %v1011_v21 = vadd.f32 %v981_v15, %v829_v19  ;;  %v767_v22 = vpop.f32.mrb[25].mxu0  ;;  %v831_v23 = vpop.f32.mrb[17].mxu1 }
 0x214   : > { %v768_v24 = vpop.f32.mrb[26].mxu0  ;;  %v832_v25 = vpop.f32.mrb[18].mxu1 }
 0x215   : > { %1028 = vst.msk [vmem:[%s1705_s27 + $0x20] sm:$0xff] %vm1023_vm2, %v995_v20  ;;  %1044 = vst.msk [vmem:[%s1705_s27 + $0xa0] sm:$0xff] %vm1023_vm2, %v1011_v21  ;;  %v996_v26 = vadd.f32 %v965_v16, %v768_v24  ;;  %v1012_v18 = vadd.f32 %v981_v15, %v832_v25  ;;  %v770_v27 = vpop.f32.mrb[27].mxu0  ;;  %v834_v28 = vpop.f32.mrb[19].mxu1 }
 0x217   : > { %1029 = vst.msk [vmem:[%s1705_s27 + $0x28] sm:$0xff] %vm1023_vm2, %v996_v26  ;;  %1045 = vst.msk [vmem:[%s1705_s27 + $0xa8] sm:$0xff] %vm1023_vm2, %v1012_v18 }
 0x21a   : > { %v773_v29 = vpop.f32.mrb[28].mxu0  ;;  %v837_v30 = vpop.f32.mrb[20].mxu1 }
 0x21b   : > { %v997_v31 = vadd.f32 %v965_v16, %v773_v29  ;;  %v1013_v32 = vadd.f32 %v981_v15, %v837_v30  ;;  %v775_v33 = vpop.f32.mrb[29].mxu0  ;;  %v839_v34 = vpop.f32.mrb[21].mxu1 }
 0x21c   : > { %v776_v35 = vpop.f32.mrb[30].mxu0  ;;  %v840_v36 = vpop.f32.mrb[22].mxu1 }
 0x21d   : > { %1030 = vst.msk [vmem:[%s1705_s27 + $0x30] sm:$0xff] %vm1023_vm2, %v997_v31  ;;  %1046 = vst.msk [vmem:[%s1705_s27 + $0xb0] sm:$0xff] %vm1023_vm2, %v1013_v32  ;;  %v998_v37 = vadd.f32 %v965_v16, %v776_v35  ;;  %v1014_v38 = vadd.f32 %v981_v15, %v840_v36  ;;  %v778_v39 = vpop.f32.mrb[31].mxu0  ;;  %v842_v40 = vpop.f32.mrb[23].mxu1 }
 0x21f   : > { %1031 = vst.msk [vmem:[%s1705_s27 + $0x38] sm:$0xff] %vm1023_vm2, %v998_v37  ;;  %1047 = vst.msk [vmem:[%s1705_s27 + $0xb8] sm:$0xff] %vm1023_vm2, %v1014_v38 }
 0x222   : > { %v781_v42 = vpop.f32.mrb[32].mxu0  ;;  %v845_v43 = vpop.f32.mrb[24].mxu1 }
 0x223   : > { %v999_v44 = vadd.f32 %v1715_v2, %v781_v42  ;;  %v1015_v45 = vadd.f32 %v985_v41, %v845_v43  ;;  %v783_v46 = vpop.f32.mrb[33].mxu0  ;;  %v847_v47 = vpop.f32.mrb[25].mxu1 }
 0x224   : > { %v784_v48 = vpop.f32.mrb[34].mxu0  ;;  %v848_v49 = vpop.f32.mrb[26].mxu1 }
 0x225   : > { %1032 = vst.msk [vmem:[%s1705_s27 + $0x40] sm:$0xff] %vm1023_vm2, %v999_v44  ;;  %1048 = vst.msk [vmem:[%s1705_s27 + $0xc0] sm:$0xff] %vm1023_vm2, %v1015_v45  ;;  %v1000_v50 = vadd.f32 %v1715_v2, %v784_v48  ;;  %v1016_v51 = vadd.f32 %v985_v41, %v848_v49  ;;  %v786_v52 = vpop.f32.mrb[35].mxu0  ;;  %v850_v53 = vpop.f32.mrb[27].mxu1 }
 0x227   : > { %1033 = vst.msk [vmem:[%s1705_s27 + $0x48] sm:$0xff] %vm1023_vm2, %v1000_v50  ;;  %1049 = vst.msk [vmem:[%s1705_s27 + $0xc8] sm:$0xff] %vm1023_vm2, %v1016_v51 }
 0x22a   : > { %v789_v55 = vpop.f32.mrb[36].mxu0  ;;  %v853_v56 = vpop.f32.mrb[28].mxu1 }
 0x22b   : > { %v1001_v57 = vadd.f32 %v1715_v2, %v789_v55  ;;  %v1017_v58 = vadd.f32 %v985_v41, %v853_v56  ;;  %v791_v59 = vpop.f32.mrb[37].mxu0  ;;  %v855_v60 = vpop.f32.mrb[29].mxu1 }
 0x22c   : > { %v792_v61 = vpop.f32.mrb[38].mxu0  ;;  %v856_v62 = vpop.f32.mrb[30].mxu1 }
 0x22d   : > { %1034 = vst.msk [vmem:[%s1705_s27 + $0x50] sm:$0xff] %vm1023_vm2, %v1001_v57  ;;  %1050 = vst.msk [vmem:[%s1705_s27 + $0xd0] sm:$0xff] %vm1023_vm2, %v1017_v58  ;;  %v1002_v63 = vadd.f32 %v1715_v2, %v792_v61  ;;  %v1018_v0 = vadd.f32 %v985_v41, %v856_v62  ;;  %v794_v1 = vpop.f32.mrb[39].mxu0  ;;  %v858_v3 = vpop.f32.mrb[31].mxu1 }
 0x22f   : > { %1035 = vst.msk [vmem:[%s1705_s27 + $0x58] sm:$0xff] %vm1023_vm2, %v1002_v63  ;;  %1051 = vst.msk [vmem:[%s1705_s27 + $0xd8] sm:$0xff] %vm1023_vm2, %v1018_v0 }
 0x232   : > { %v797_v5 = vpop.f32.mrb[40].mxu0  ;;  %v861_v6 = vpop.f32.mrb[32].mxu1 }
 0x233   : > { %v1003_v7 = vadd.f32 %v973_v54, %v797_v5  ;;  %v1019_v8 = vadd.f32 %v989_v4, %v861_v6  ;;  %v799_v9 = vpop.f32.mrb[41].mxu0  ;;  %v863_v10 = vpop.f32.mrb[33].mxu1 }
 0x234   : > { %v800_v2 = vpop.f32.mrb[42].mxu0  ;;  %v864_v11 = vpop.f32.mrb[34].mxu1 }
 0x235   : > { %1036 = vst.msk [vmem:[%s1705_s27 + $0x60] sm:$0xff] %vm1023_vm2, %v1003_v7  ;;  %1052 = vst.msk [vmem:[%s1705_s27 + $0xe0] sm:$0xff] %vm1023_vm2, %v1019_v8  ;;  %v1004_v12 = vadd.f32 %v973_v54, %v800_v2  ;;  %v1020_v13 = vadd.f32 %v989_v4, %v864_v11  ;;  %v802_v14 = vpop.f32.mrb[43].mxu0  ;;  %v866_v15 = vpop.f32.mrb[35].mxu1 }
 0x237   : > { %1037 = vst.msk [vmem:[%s1705_s27 + $0x68] sm:$0xff] %vm1023_vm2, %v1004_v12  ;;  %1053 = vst.msk [vmem:[%s1705_s27 + $0xe8] sm:$0xff] %vm1023_vm2, %v1020_v13 }
 0x23a   : > { %v805_v16 = vpop.f32.mrb[44].mxu0  ;;  %v869_v17 = vpop.f32.mrb[36].mxu1 }
 0x23b   : > { %v1005_v19 = vadd.f32 %v973_v54, %v805_v16  ;;  %v1021_v20 = vadd.f32 %v989_v4, %v869_v17  ;;  %v807_v21 = vpop.f32.mrb[45].mxu0  ;;  %v871_v22 = vpop.f32.mrb[37].mxu1 }
 0x23c   : > { %v808_v23 = vpop.f32.mrb[46].mxu0  ;;  %v872_v24 = vpop.f32.mrb[38].mxu1 }
 0x23d   : > { %1038 = vst.msk [vmem:[%s1705_s27 + $0x70] sm:$0xff] %vm1023_vm2, %v1005_v19  ;;  %1054 = vst.msk [vmem:[%s1705_s27 + $0xf0] sm:$0xff] %vm1023_vm2, %v1021_v20  ;;  %v1006_v25 = vadd.f32 %v973_v54, %v808_v23  ;;  %v1022_v26 = vadd.f32 %v989_v4, %v872_v24  ;;  %v810_v18 = vpop.f32.mrb[47].mxu0  ;;  %v874_v27 = vpop.f32.mrb[39].mxu1 }
 0x23f   : > { %1039 = vst.msk [vmem:[%s1705_s27 + $0x78] sm:$0xff] %vm1023_vm2, %v1006_v25  ;;  %1055 = vst.msk [vmem:[%s1705_s27 + $0xf8] sm:$0xff] %vm1023_vm2, %v1022_v26 }
 0x240   : > { %1376 = shalt.err (!%p1373_p3)
}
 0x241   : > { %s1377_s11 = scalar_lea.hbm %s1774_s6, 4096  ;;  %s1381_s14 = scalar_lea.hbm %s1833_s4, 8192 }
 0x242   : > { %p1378_p4 = scmp.ne.s32.totalorder %s1774_s6, %s1377_s11  ;;  %p1382_p9 = scmp.lt.u32.totalorder %s1774_s6, %s1833_s4 }
 0x243   : > { %p1383_p10 = scmp.lt.u32.totalorder %s1381_s14, %s1377_s11  ;;  %p1385_p12 = scmp.lt.u32.totalorder %s1377_s11, %s1774_s6 }
 0x244   : > { %p1379_p7 = pnand %p1378_p4, %p1496_p5 }
 0x245   : > { %p1384_p11 = por %p1383_p10, %p1382_p9 }
 0x246   : > { %p1380_p8 = pneg %p1379_p7 }
 0x247   : > { %p1386_p13 = por %p1385_p12, %p1384_p11 }
 0x249   : > { %p1387_p0 = pnand %p1386_p13, %p1380_p8 }
 0x24b   : > { %1390 = shalt.err (!%p1387_p0)
}
 0x24c   : > { %s1431_s23 = smov 128   ;;  %s1432_s27 = smov 8  }
 0x24d   : > { %1268 = dma.vmem_to_hbm [thread:$0]  (%p1496_p5), %s1776_s29, 4096, %s1774_s6, %s1788_s19, %s1431_s23, %s1431_s23, %s1432_s27  }
 0x24e PF: > { %p1274_p1 = scmp.ge.s32.totalorder %s1425_s18, 2  ;;  %s1085_s28 = sand.u32 1, %s1413_s15  }
 0x24f   : > { %s1086_s30 = scalar_lea.sflag [#allocation4], %s1085_s28 }
 0x250   : > { %p1271_p2 = pnand %p1274_p1, %p1500_p6 }
 0x252   : > { %1408 = dma.done.wait (!%p1271_p2), %s1086_s30, 4096  }
 0x253   : > { %1410 = vsyncadd (!%p1271_p2), %s1086_s30, 4294963200  ;;  %p14_p3 = scmp.ge.s32.totalorder %s1483_s21, 4   ;;  %s1836_s15 = smov %s1417_s16 }
 0x254   : > { %s1837_s16 = smov %s1421_s17  ;;  %s1838_s17 = smov %s1494_s24 }
 0x255   : > { %s1839_s18 = smov %s1483_s21  ;;  %16 = sbr.rel (!%p14_p3) target bundleno = 3 (0x3), region = 71 }
 0x25c   :  { %1091 = vsyncpa [#allocation4], 1 }
 0x25d   :  { %1093 = vsyncpa [#allocation4 + $0x1], 1 }

</bundles_post_ra>
